<compile_context>
chip_gen: v7x
topology: tpu7x:2x2x1
jax: 0.10.0
libtpu: 0.0.40
codegen_flags: <defaults>
</compile_context>

<pallas_src>
import functools

import jax
import jax.numpy as jnp
from jax import lax
from jax.experimental import pallas as pl
from jax.experimental.pallas import tpu as pltpu

LN_EPS = 1e-5  # PyTorch nn.LayerNorm default


def _layernorm(x, gamma, beta):
    mu = jnp.mean(x, axis=-1, keepdims=True)
    d = x - mu
    var = jnp.mean(d * d, axis=-1, keepdims=True)
    return d * lax.rsqrt(var + LN_EPS) * gamma + beta


def critic_kernel(state_ref, action_ref, w1_ref, w2_ref, wa_ref,
                  p40_ref, p30_ref, out_ref):
    # Packed parameter slabs (f32, VMEM-resident).
    p40 = p40_ref[...]                       # (3, 40):  [b1; g1; be1]
    p30 = p30_ref[...]                       # (6, 30):  [b2; g2; be2; ba; w3_row; b3]
    b1, g1, be1 = p40[0:1], p40[1:2], p40[2:3]
    b2, g2, be2 = p30[0:1], p30[1:2], p30[2:3]
    ba, w3row = p30[3:4], p30[4:5]
    b3 = p30[5:6, 0:1]

    # In-kernel bf16 cast of the batch streams (VPU); weights are already bf16.
    state_bf = state_ref[...].astype(jnp.bfloat16)
    action_bf = action_ref[...].astype(jnp.bfloat16)

    # fc1 (bf16 MXU, f32 accumulate) -> LayerNorm(40) -> relu (f32 VPU/EUP)
    x = jnp.dot(state_bf, w1_ref[...], preferred_element_type=jnp.float32) + b1
    x = jnp.maximum(_layernorm(x, g1, be1), 0.0)

    # fc2 (f32; x never leaves VMEM) -> LayerNorm(30)
    x = jnp.dot(x, w2_ref[...], preferred_element_type=jnp.float32) + b2
    x = _layernorm(x, g2, be2)

    # action branch (bf16 MXU, f32 accumulate)
    av = jnp.dot(action_bf, wa_ref[...], preferred_element_type=jnp.float32) + ba

    # combine
    sav = jnp.maximum(x + av, 0.0)           # (BT, 30), f32

    # fc3 as an (8,30) x (BT,30)^T MXU matmul -> lane-dense (8, BT) result
    # (all 8 rows identical; the wrapper keeps row 0).  This avoids the
    # (BT, 1) lane-sparse store path entirely.
    w3slab = jnp.broadcast_to(w3row, (8, w3row.shape[1]))
    out_blk = lax.dot_general(w3slab, sav, (((1,), (1,)), ((), ())),
                              preferred_element_type=jnp.float32) + b3
    out_ref[0] = out_blk.astype(out_ref.dtype)


def _pack_params(params):
    """bf16-cast the batch-facing matmul weights; pack the tiny per-feature params."""
    w1 = params["w1"].astype(jnp.bfloat16)
    wa = params["wa"].astype(jnp.bfloat16)
    w2 = params["w2"].astype(jnp.float32)
    p40 = jnp.concatenate(
        [params["b1"], params["g1"], params["be1"]], axis=0).astype(jnp.float32)
    w3row = params["w3"].T                                   # (1, 30)
    b3row = jnp.broadcast_to(params["b3"], (1, 30))
    p30 = jnp.concatenate(
        [params["b2"], params["g2"], params["be2"], params["ba"], w3row, b3row],
        axis=0).astype(jnp.float32)
    return w1, w2, wa, p40, p30


@functools.partial(jax.jit, static_argnames=("max_bt",))
def critic_forward(state, action, params, *, max_bt=2048):
    B, d_in = state.shape
    n_actions = action.shape[1]

    # Batch tile (rows per grid step): multiple of 8, capped at max_bt, and
    # capped at ~ceil(B/2) so there are >= 2 grid steps whenever B > 8 (lets
    # v7x split the 'parallel' batch axis across both TensorCores).
    half_rows = (B + 1) // 2
    bt_cap = ((half_rows + 7) // 8) * 8
    BT = max(8, min(max_bt, bt_cap))
    grid_steps = pl.cdiv(B, BT)

    w1, w2, wa, p40, p30 = _pack_params(params)

    def stream_spec(feat):
        return pl.BlockSpec((BT, feat), lambda i: (i, 0))

    def resident_spec(shape):
        return pl.BlockSpec(shape, lambda i: (0, 0))

    out3 = pl.pallas_call(
        critic_kernel,
        out_shape=jax.ShapeDtypeStruct((grid_steps, 8, BT), jnp.float32),
        grid=(grid_steps,),
        in_specs=[
            stream_spec(d_in),            # state   (tiled over batch, f32)
            stream_spec(n_actions),       # action  (tiled over batch, f32)
            resident_spec(w1.shape),      # w1      (resident, bf16)
            resident_spec(w2.shape),      # w2      (resident, f32)
            resident_spec(wa.shape),      # wa      (resident, bf16)
            resident_spec(p40.shape),     # packed b1/g1/be1
            resident_spec(p30.shape),     # packed b2/g2/be2/ba/w3/b3
        ],
        out_specs=pl.BlockSpec((1, 8, BT), lambda i: (i, 0, 0)),
        compiler_params=pltpu.CompilerParams(
            dimension_semantics=("parallel",),     # v7x: split batch over 2 TCs
            vmem_limit_bytes=32 * 1024 * 1024,     # safe on v5e/v6e/v7x
        ),
    )(state, action, w1, w2, wa, p40, p30)

    # Row 0 holds the result; drop batch padding and restore the (B, 1) shape.
    return out3[:, 0, :].reshape(-1)[:B].reshape(B, 1)


def init_params(key, input_dim, n_actions):
    """Deterministic parameter init mimicking the PyTorch module's shapes."""
    ks = jax.random.split(key, 8)

    def uniform(k, shape, bound):
        return jax.random.uniform(k, shape, jnp.float32, -bound, bound)

    f1 = 1.0 / jnp.sqrt(jnp.float32(input_dim))
    f2 = 1.0 / jnp.sqrt(jnp.float32(40))
    fa = 1.0 / jnp.sqrt(jnp.float32(n_actions))
    f3 = 0.003

    return {
        # stored (in, out); PyTorch stores (out, in)
        "w1": uniform(ks[0], (input_dim, 40), f1),
        "b1": uniform(ks[1], (1, 40), f1),
        "g1": jnp.ones((1, 40), jnp.float32),
        "be1": jnp.zeros((1, 40), jnp.float32),
        "w2": uniform(ks[2], (40, 30), f2),
        "b2": uniform(ks[3], (1, 30), f2),
        "g2": jnp.ones((1, 30), jnp.float32),
        "be2": jnp.zeros((1, 30), jnp.float32),
        "wa": uniform(ks[4], (n_actions, 30), fa),
        "ba": uniform(ks[5], (1, 30), fa),
        "w3": uniform(ks[6], (30, 1), f3),
        "b3": uniform(ks[7], (1, 1), f3),
    }


def critic_reference(state, action, p):
    """Pure-JAX reference mirroring the PyTorch forward (and the kernel's
    bf16 quantization of the batch-facing matmul operands, upcast to f32)."""
    def ln(x, g, b):
        mu = jnp.mean(x, -1, keepdims=True)
        var = jnp.mean((x - mu) ** 2, -1, keepdims=True)
        return (x - mu) / jnp.sqrt(var + LN_EPS) * g + b

    f32 = jnp.float32
    state = state.astype(jnp.bfloat16).astype(f32)
    action = action.astype(jnp.bfloat16).astype(f32)
    w1 = p["w1"].astype(jnp.bfloat16).astype(f32)
    wa = p["wa"].astype(jnp.bfloat16).astype(f32)

    x = state @ w1 + p["b1"]
    x = jnp.maximum(ln(x, p["g1"], p["be1"]), 0.0)
    x = x @ p["w2"] + p["b2"]
    x = ln(x, p["g2"], p["be2"])
    av = action @ wa + p["ba"]
    sav = jnp.maximum(x + av, 0.0)
    return sav @ p["w3"] + p["b3"]


if __name__ == "__main__":
    key = jax.random.PRNGKey(0)
    k_state, k_action, k_params, k_s2, k_a2, k_s3, k_a3 = jax.random.split(key, 7)

    input_dim, n_actions = 16, 4
    params = init_params(k_params, input_dim, n_actions)

    # Small test (single grid step).
    B = 8
    state = jax.random.normal(k_state, (B, input_dim), jnp.float32)
    action = jax.random.normal(k_action, (B, n_actions), jnp.float32)
    out = jax.block_until_ready(critic_forward(state, action, params))
    ref = critic_reference(state, action, params)
    assert out.shape == (B, 1)
    assert jnp.allclose(out, ref, atol=5e-4, rtol=5e-4), (out, ref)

    # Multi-step grid test with a partial final tile (exercises batch tiling).
    B2 = 100
    state2 = jax.random.normal(k_s2, (B2, input_dim), jnp.float32)
    action2 = jax.random.normal(k_a2, (B2, n_actions), jnp.float32)
    out2 = jax.block_until_ready(critic_forward(state2, action2, params, max_bt=32))
    ref2 = critic_reference(state2, action2, params)
    assert out2.shape == (B2, 1)
    assert jnp.allclose(out2, ref2, atol=5e-4, rtol=5e-4), (out2, ref2)

    # Default max_bt path: BT capped at ~B/2 -> 2 grid steps (v7x split), partial tile.
    B3 = 300
    state3 = jax.random.normal(k_s3, (B3, input_dim), jnp.float32)
    action3 = jax.random.normal(k_a3, (B3, n_actions), jnp.float32)
    out3 = jax.block_until_ready(critic_forward(state3, action3, params))
    ref3 = critic_reference(state3, action3, params)
    assert out3.shape == (B3, 1)
    assert jnp.allclose(out3, ref3, atol=5e-4, rtol=5e-4), (out3, ref3)

    print("KERNEL_OK")
</pallas_src>

<mosaic_0001>
module attributes {stable_mosaic.version = 11 : i64} {
  func.func @critic_kernel(%arg0: i32, %arg1: memref<8x16xf32, #tpu.memory_space<vmem>>, %arg2: memref<8x4xf32, #tpu.memory_space<vmem>>, %arg3: memref<16x40xbf16, #tpu.memory_space<vmem>>, %arg4: memref<40x30xf32, #tpu.memory_space<vmem>>, %arg5: memref<4x30xbf16, #tpu.memory_space<vmem>>, %arg6: memref<3x40xf32, #tpu.memory_space<vmem>>, %arg7: memref<6x30xf32, #tpu.memory_space<vmem>>, %arg8: memref<1x8x8xf32, #tpu.memory_space<vmem>>) attributes {dimension_semantics = [#tpu.dimension_semantics<parallel>], iteration_bounds = array<i64: 1>, scalar_prefetch = 0 : i64, scratch_operands = 0 : i64, tpu.core_type = #tpu.core_type<tc>, window_params = [{transform_indices = @transform_0, window_bounds = array<i64: 8, 16>}, {transform_indices = @transform_1, window_bounds = array<i64: 8, 4>}, {pipeline_mode = #tpu.pipeline_mode<synchronous>, transform_indices = @transform_2, window_bounds = array<i64: 16, 40>}, {pipeline_mode = #tpu.pipeline_mode<synchronous>, transform_indices = @transform_3, window_bounds = array<i64: 40, 30>}, {pipeline_mode = #tpu.pipeline_mode<synchronous>, transform_indices = @transform_4, window_bounds = array<i64: 4, 30>}, {pipeline_mode = #tpu.pipeline_mode<synchronous>, transform_indices = @transform_5, window_bounds = array<i64: 3, 40>}, {pipeline_mode = #tpu.pipeline_mode<synchronous>, transform_indices = @transform_6, window_bounds = array<i64: 6, 30>}, {transform_indices = @transform_7, window_bounds = array<i64: 1, 8, 8>}]} {
    %c0 = arith.constant 0 : index
    %c0_0 = arith.constant 0 : index
    %0 = vector.load %arg6[%c0, %c0_0] : memref<3x40xf32, #tpu.memory_space<vmem>>, vector<3x40xf32>
    %c0_1 = arith.constant 0 : index
    %c0_2 = arith.constant 0 : index
    %1 = vector.load %arg7[%c0_1, %c0_2] : memref<6x30xf32, #tpu.memory_space<vmem>>, vector<6x30xf32>
    %2 = vector.extract_strided_slice %0 {offsets = [0, 0], sizes = [1, 40], strides = [1, 1]} : vector<3x40xf32> to vector<1x40xf32>
    %3 = vector.extract_strided_slice %0 {offsets = [1, 0], sizes = [1, 40], strides = [1, 1]} : vector<3x40xf32> to vector<1x40xf32>
    %4 = vector.extract_strided_slice %0 {offsets = [2, 0], sizes = [1, 40], strides = [1, 1]} : vector<3x40xf32> to vector<1x40xf32>
    %5 = vector.extract_strided_slice %1 {offsets = [0, 0], sizes = [1, 30], strides = [1, 1]} : vector<6x30xf32> to vector<1x30xf32>
    %6 = vector.extract_strided_slice %1 {offsets = [1, 0], sizes = [1, 30], strides = [1, 1]} : vector<6x30xf32> to vector<1x30xf32>
    %7 = vector.extract_strided_slice %1 {offsets = [2, 0], sizes = [1, 30], strides = [1, 1]} : vector<6x30xf32> to vector<1x30xf32>
    %8 = vector.extract_strided_slice %1 {offsets = [3, 0], sizes = [1, 30], strides = [1, 1]} : vector<6x30xf32> to vector<1x30xf32>
    %9 = vector.extract_strided_slice %1 {offsets = [4, 0], sizes = [1, 30], strides = [1, 1]} : vector<6x30xf32> to vector<1x30xf32>
    %10 = vector.extract_strided_slice %1 {offsets = [5, 0], sizes = [1, 1], strides = [1, 1]} : vector<6x30xf32> to vector<1x1xf32>
    %c0_3 = arith.constant 0 : index
    %c0_4 = arith.constant 0 : index
    %11 = vector.load %arg1[%c0_3, %c0_4] : memref<8x16xf32, #tpu.memory_space<vmem>>, vector<8x16xf32>
    %12 = arith.truncf %11 : vector<8x16xf32> to vector<8x16xbf16>
    %c0_5 = arith.constant 0 : index
    %c0_6 = arith.constant 0 : index
    %13 = vector.load %arg2[%c0_5, %c0_6] : memref<8x4xf32, #tpu.memory_space<vmem>>, vector<8x4xf32>
    %14 = arith.truncf %13 : vector<8x4xf32> to vector<8x4xbf16>
    %c0_7 = arith.constant 0 : index
    %c0_8 = arith.constant 0 : index
    %15 = vector.load %arg3[%c0_7, %c0_8] : memref<16x40xbf16, #tpu.memory_space<vmem>>, vector<16x40xbf16>
    %cst = arith.constant dense<0.000000e+00> : vector<8x40xf32>
    %16 = tpu.matmul %12, %15, %cst {dimension_numbers = #tpu.dot_dimension_numbers<[1], [0], [0], [1], [0, 0, 1, 1], [], []>} : vector<8x16xbf16>, vector<16x40xbf16>, vector<8x40xf32> -> vector<8x40xf32>
    %17 = vector.broadcast %2 : vector<1x40xf32> to vector<8x40xf32>
    %18 = arith.addf %16, %17 : vector<8x40xf32>
    %cst_9 = arith.constant dense<0.000000e+00> : vector<8xf32>
    %19 = vector.multi_reduction <add>, %18, %cst_9 [1] : vector<8x40xf32> to vector<8xf32>
    %20 = vector.shape_cast %19 : vector<8xf32> to vector<8x1xf32>
    %cst_10 = arith.constant 4.000000e+01 : f32
    %21 = vector.broadcast %cst_10 : f32 to vector<8x1xf32>
    %22 = arith.divf %20, %21 : vector<8x1xf32>
    %23 = vector.broadcast %22 : vector<8x1xf32> to vector<8x40xf32>
    %24 = arith.subf %18, %23 : vector<8x40xf32>
    %25 = arith.mulf %24, %24 : vector<8x40xf32>
    %cst_11 = arith.constant dense<0.000000e+00> : vector<8xf32>
    %26 = vector.multi_reduction <add>, %25, %cst_11 [1] : vector<8x40xf32> to vector<8xf32>
    %27 = vector.shape_cast %26 : vector<8xf32> to vector<8x1xf32>
    %cst_12 = arith.constant 4.000000e+01 : f32
    %28 = vector.broadcast %cst_12 : f32 to vector<8x1xf32>
    %29 = arith.divf %27, %28 : vector<8x1xf32>
    %cst_13 = arith.constant 9.99999974E-6 : f32
    %30 = vector.broadcast %cst_13 : f32 to vector<8x1xf32>
    %31 = arith.addf %29, %30 : vector<8x1xf32>
    %32 = math.rsqrt %31 : vector<8x1xf32>
    %33 = vector.broadcast %32 : vector<8x1xf32> to vector<8x40xf32>
    %34 = arith.mulf %24, %33 : vector<8x40xf32>
    %35 = vector.broadcast %3 : vector<1x40xf32> to vector<8x40xf32>
    %36 = arith.mulf %34, %35 : vector<8x40xf32>
    %37 = vector.broadcast %4 : vector<1x40xf32> to vector<8x40xf32>
    %38 = arith.addf %36, %37 : vector<8x40xf32>
    %cst_14 = arith.constant 0.000000e+00 : f32
    %39 = vector.broadcast %cst_14 : f32 to vector<8x40xf32>
    %40 = arith.maximumf %38, %39 : vector<8x40xf32>
    %c0_15 = arith.constant 0 : index
    %c0_16 = arith.constant 0 : index
    %41 = vector.load %arg4[%c0_15, %c0_16] : memref<40x30xf32, #tpu.memory_space<vmem>>, vector<40x30xf32>
    %cst_17 = arith.constant dense<0.000000e+00> : vector<8x30xf32>
    %42 = tpu.matmul %40, %41, %cst_17 {dimension_numbers = #tpu.dot_dimension_numbers<[1], [0], [0], [1], [0, 0, 1, 1], [], []>} : vector<8x40xf32>, vector<40x30xf32>, vector<8x30xf32> -> vector<8x30xf32>
    %43 = vector.broadcast %5 : vector<1x30xf32> to vector<8x30xf32>
    %44 = arith.addf %42, %43 : vector<8x30xf32>
    %cst_18 = arith.constant dense<0.000000e+00> : vector<8xf32>
    %45 = vector.multi_reduction <add>, %44, %cst_18 [1] : vector<8x30xf32> to vector<8xf32>
    %46 = vector.shape_cast %45 : vector<8xf32> to vector<8x1xf32>
    %cst_19 = arith.constant 3.000000e+01 : f32
    %47 = vector.broadcast %cst_19 : f32 to vector<8x1xf32>
    %48 = arith.divf %46, %47 : vector<8x1xf32>
    %49 = vector.broadcast %48 : vector<8x1xf32> to vector<8x30xf32>
    %50 = arith.subf %44, %49 : vector<8x30xf32>
    %51 = arith.mulf %50, %50 : vector<8x30xf32>
    %cst_20 = arith.constant dense<0.000000e+00> : vector<8xf32>
    %52 = vector.multi_reduction <add>, %51, %cst_20 [1] : vector<8x30xf32> to vector<8xf32>
    %53 = vector.shape_cast %52 : vector<8xf32> to vector<8x1xf32>
    %cst_21 = arith.constant 3.000000e+01 : f32
    %54 = vector.broadcast %cst_21 : f32 to vector<8x1xf32>
    %55 = arith.divf %53, %54 : vector<8x1xf32>
    %cst_22 = arith.constant 9.99999974E-6 : f32
    %56 = vector.broadcast %cst_22 : f32 to vector<8x1xf32>
    %57 = arith.addf %55, %56 : vector<8x1xf32>
    %58 = math.rsqrt %57 : vector<8x1xf32>
    %59 = vector.broadcast %58 : vector<8x1xf32> to vector<8x30xf32>
    %60 = arith.mulf %50, %59 : vector<8x30xf32>
    %61 = vector.broadcast %6 : vector<1x30xf32> to vector<8x30xf32>
    %62 = arith.mulf %60, %61 : vector<8x30xf32>
    %63 = vector.broadcast %7 : vector<1x30xf32> to vector<8x30xf32>
    %64 = arith.addf %62, %63 : vector<8x30xf32>
    %c0_23 = arith.constant 0 : index
    %c0_24 = arith.constant 0 : index
    %65 = vector.load %arg5[%c0_23, %c0_24] : memref<4x30xbf16, #tpu.memory_space<vmem>>, vector<4x30xbf16>
    %cst_25 = arith.constant dense<0.000000e+00> : vector<8x30xf32>
    %66 = tpu.matmul %14, %65, %cst_25 {dimension_numbers = #tpu.dot_dimension_numbers<[1], [0], [0], [1], [0, 0, 1, 1], [], []>} : vector<8x4xbf16>, vector<4x30xbf16>, vector<8x30xf32> -> vector<8x30xf32>
    %67 = vector.broadcast %8 : vector<1x30xf32> to vector<8x30xf32>
    %68 = arith.addf %66, %67 : vector<8x30xf32>
    %69 = arith.addf %64, %68 : vector<8x30xf32>
    %cst_26 = arith.constant 0.000000e+00 : f32
    %70 = vector.broadcast %cst_26 : f32 to vector<8x30xf32>
    %71 = arith.maximumf %69, %70 : vector<8x30xf32>
    %72 = vector.shape_cast %9 : vector<1x30xf32> to vector<1x30xf32>
    %73 = vector.broadcast %72 : vector<1x30xf32> to vector<8x30xf32>
    %cst_27 = arith.constant dense<0.000000e+00> : vector<8x8xf32>
    %74 = tpu.matmul %73, %71, %cst_27 {dimension_numbers = #tpu.dot_dimension_numbers<[1], [1], [0], [0], [0, 0, 1, 0], [], []>} : vector<8x30xf32>, vector<8x30xf32>, vector<8x8xf32> -> vector<8x8xf32>
    %75 = vector.broadcast %10 : vector<1x1xf32> to vector<8x8xf32>
    %76 = arith.addf %74, %75 : vector<8x8xf32>
    %c0_28 = arith.constant 0 : index
    %c0_29 = arith.constant 0 : index
    %c0_30 = arith.constant 0 : index
    %77 = vector.load %arg8[%c0_28, %c0_29, %c0_30] : memref<1x8x8xf32, #tpu.memory_space<vmem>>, vector<1x8x8xf32>
    %78 = vector.shape_cast %77 : vector<1x8x8xf32> to vector<8x8xf32>
    %79 = vector.shape_cast %76 : vector<8x8xf32> to vector<1x8x8xf32>
    tpu.vector_store %arg8[%c0_28, %c0_29, %c0_30], %79 {strides = array<i32>} : memref<1x8x8xf32, #tpu.memory_space<vmem>>, vector<1x8x8xf32>,
    return
  }
  func.func @transform_0(%arg0: i32) -> (i32, i32) {
    %c0_i32 = arith.constant 0 : i32
    %c0_i32_0 = arith.constant 0 : i32
    return %arg0, %c0_i32 : i32, i32
  }
  func.func @transform_1(%arg0: i32) -> (i32, i32) {
    %c0_i32 = arith.constant 0 : i32
    %c0_i32_0 = arith.constant 0 : i32
    return %arg0, %c0_i32 : i32, i32
  }
  func.func @transform_2(%arg0: i32) -> (i32, i32) {
    %c0_i32 = arith.constant 0 : i32
    %c0_i32_0 = arith.constant 0 : i32
    %c0_i32_1 = arith.constant 0 : i32
    return %c0_i32, %c0_i32_0 : i32, i32
  }
  func.func @transform_3(%arg0: i32) -> (i32, i32) {
    %c0_i32 = arith.constant 0 : i32
    %c0_i32_0 = arith.constant 0 : i32
    %c0_i32_1 = arith.constant 0 : i32
    return %c0_i32, %c0_i32_0 : i32, i32
  }
  func.func @transform_4(%arg0: i32) -> (i32, i32) {
    %c0_i32 = arith.constant 0 : i32
    %c0_i32_0 = arith.constant 0 : i32
    %c0_i32_1 = arith.constant 0 : i32
    return %c0_i32, %c0_i32_0 : i32, i32
  }
  func.func @transform_5(%arg0: i32) -> (i32, i32) {
    %c0_i32 = arith.constant 0 : i32
    %c0_i32_0 = arith.constant 0 : i32
    %c0_i32_1 = arith.constant 0 : i32
    return %c0_i32, %c0_i32_0 : i32, i32
  }
  func.func @transform_6(%arg0: i32) -> (i32, i32) {
    %c0_i32 = arith.constant 0 : i32
    %c0_i32_0 = arith.constant 0 : i32
    %c0_i32_1 = arith.constant 0 : i32
    return %c0_i32, %c0_i32_0 : i32, i32
  }
  func.func @transform_7(%arg0: i32) -> (i32, i32, i32) {
    %c0_i32 = arith.constant 0 : i32
    %c0_i32_0 = arith.constant 0 : i32
    %c0_i32_1 = arith.constant 0 : i32
    return %arg0, %c0_i32, %c0_i32_0 : i32, i32, i32
  }
}

</mosaic_0001>

<bundles_post_ra>
// kernel: critic_forward.1
= control target key start
LH: loop header
LB: loop body
LE: loop exit
PB: predicated region body
PF: predicated region fallthrough
CT: control target
= control target key end

     0   :  { %v432_v0 = vmov 0.0   ;;  %vm433_vm0 = vmmov 0   ;;  %vm45_vm1 = vcmask 130048   ;;  %v35_v4 = vlaneseq  ;;  %s537_s2 = inlined_call_operand.vmem [shape: bf16[16,40], index: 2, kind: input, shape index: {}]   ;;  %s538_s0 = inlined_call_operand.vmem [shape: f32[8,16], index: 0, kind: input, shape index: {}]   ;;  %s539_s5 = inlined_call_operand.vmem [shape: f32[3,40], index: 5, kind: input, shape index: {}]   ;;  %s540_s3 = inlined_call_operand.vmem [shape: f32[40,30], index: 3, kind: input, shape index: {}]   ;;  %s541_s4 = inlined_call_operand.vmem [shape: bf16[4,30], index: 4, kind: input, shape index: {}]   ;;  %s542_s1 = inlined_call_operand.vmem [shape: f32[8,4], index: 1, kind: input, shape index: {}]   ;;  %s543_s6 = inlined_call_operand.vmem [shape: f32[6,30], index: 6, kind: input, shape index: {}]   ;;  %s544_s7 = inlined_call_operand.vmem [shape: f32[1,8,8], index: 7, kind: output, shape index: {}]  }
   0x1   :  { %386 = vmatprep.subr.bf16.mxu0 %v432_v0  ;;  %v427_v1 = vld [vmem:[%s537_s2] sm:$0xff]   ;;  %388 = vmatprep.mubr.msk.bf16.mxu0 %vm433_vm0, %v432_v0  ;;  %vm89_vm2 = vcmask 326656   ;;  %v116_v21 = vld [vmem:[%s540_s3 + $0x8] sm:$0xff]  ;;  %v434_v23 = vmov 0.0|0.0   ;;  %v117_v24 = vld [vmem:[%s540_s3 + $0x10] sm:$0xff]  ;;  %vm231_vm3 = vcmask 1041408  }
   0x2   :  { %v29_v2 = vld [vmem:[%s538_s0] sm:$0xff]  ;;  %402 = vmatprep.mubr.msk.f32.mxu1 %vm433_vm0, %v432_v0  ;;  %387 = vmatpush3.bf16.msra.mxu0 %v427_v1  ;;  %v489_v5 = vshrl.u32 %v35_v4, 7  ;;  %v118_v25 = vld [vmem:[%s540_s3 + $0x18] sm:$0xff]  ;;  %vm227_vm4 = vcmask 31744   ;;  %vm197_vm5 = vcmask 244736   ;;  %vm362_vm6 = vcmask 64512  }
   0x3   :  { %v30_v3 = vpack.c.bf16 %v29_v2, %v29_v2  ;;  %405 = vmatprep.subr.bf16.mxu0 %v432_v0  ;;  %v27_v7 = vld [vmem:[%s539_s5] sm:$0x7]  ;;  %416 = vmatprep.subr.bf16.mxu1 %v434_v23  ;;  %v420_v26 = vpack.c.bf16 %v118_v25, %v117_v24 }
   0x4   :  { %v37_v6 = vsub.s32 0, %v489_v5  ;;  %v115_v20 = vld [vmem:[%s540_s3] sm:$0xff]  ;;  %v106_v31 = vsub.s32 1, %v489_v5  ;;  %v111_v32 = vsub.s32 2, %v489_v5  ;;  %v225_v63 = vsub.s32 3, %v489_v5 }
   0x5   :  { %389 = vmatmul.mubr.msk.bf16.vlgmr.msra.gmra.mrb[0].mxu0 %vm45_vm1, %v30_v3  ;;  %v417_v22 = vpack.c.bf16 %v116_v21, %v115_v20  ;;  %v119_v27 = vld [vmem:[%s540_s3 + $0x20] sm:$0xff] }
   0x6   :  { %407 = vmatprep.mubr.msk.bf16.mxu0 %vm433_vm0, %v432_v0  ;;  %v38_v8 = vrot.slane %v27_v7, %v37_v6  ;;  %v107_v33 = vrot.slane %v27_v7, %v106_v31  ;;  %v112_v35 = vrot.slane %v27_v7, %v111_v32  ;;  %v222_v40 = vld [vmem:[%s541_s4] sm:$0x3] }
   0x7   :  { %418 = vmatpush3.bf16.msra.mxu1 %v417_v22  ;;  %v31_v41 = vld [vmem:[%s542_s1] sm:$0xff]  ;;  %v233_v42 = vsel %vm231_vm3, %v222_v40, 0 }
   0x8   :  { %419 = vmatprep.subr.bf16.mxu1 %v434_v23  ;;  %v32_v43 = vpack.c.bf16 %v31_v41, %v31_v41  ;;  %406 = vmatpush3.bf16.msra.mxu0 %v233_v42  ;;  %v28_v44 = vld [vmem:[%s543_s6] sm:$0x3f] }
   0x9   :  { %v123_v45 = vrot.slane %v28_v44, %v37_v6  ;;  %v282_v59 = vrot.slane %v28_v44, 5  ;;  %v226_v1 = vrot.slane %v28_v44, %v225_v63  ;;  %v220_v4 = vrot.slane %v28_v44, %v111_v32 }
   0xb   :  { %421 = vmatpush3.bf16.msra.mxu1 %v420_v26  ;;  %422 = vpush %v282_v59 }
   0xc   :  { %400 = vmatprep.subr.mxu1 %v432_v0 }
   0xd   :  { %408 = vmatmul.mubr.msk.bf16.vlgmr.msra.gmra.mrb[4].mxu0 %vm227_vm4, %v32_v43 }
   0xf   :  { %401 = vmatpush3.msra.mxu1 %v119_v27 }
  0x10   :  { %411 = vmatprep.subr.mxu1 %v432_v0 }
  0x3c   :  { %s423_s1 = spop %422 }
  0xd8   :  { %v83_v9 = vpop.f32.mrb[0].mxu0 }
  0xd9   :  { %v84_v10 = vadd.f32 %v83_v9, %v38_v8  ;;  %v390_v11 = vpop.f32.mrb[1].mxu0  ;;  %v279_v9 = vsub.s32 4, %v489_v5 }
  0xda   :  { %v86_v12 = vpop.f32.mrb[2].mxu0 }
  0xdb   :  { %v391_v13 = vpop.f32.mrb[3].mxu0  ;;  %v90_v14 = vsel %vm89_vm2, %v84_v10, 0.0  ;;  %v280_v12 = vrot.slane %v28_v44, %v279_v9 }
  0xdc   :  { %91 = vadd.xlane.f32.xlu0 %v90_v14  ;;  %v284_v13 = vstv %s423_s1 }
  0xe0   :  { %v269_v55 = vpop.f32.mrb[4].mxu0 }
  0xe1   :  { %v409_v56 = vpop.f32.mrb[5].mxu0  ;;  %v270_v7 = vadd.f32 %v269_v55, %v226_v1 }
  0xe2   :  { %v272_v57 = vpop.f32.mrb[6].mxu0 }
  0xe3   :  { %v410_v58 = vpop.f32.mrb[7].mxu0 }
 0x169   :  { %v92_v15 = vpop.xlane.xlu0 %91 }
 0x16a   :  { %v94_v16 = vmul.f32 0.025, %v92_v15 }
 0x16c   :  { %v95_v17 = vsub.f32 %v84_v10, %v94_v16 }
 0x16e   :  { %v96_v18 = vmul.f32 %v95_v17, %v95_v17 }
 0x170   :  { %v97_v19 = vsel %vm89_vm2, %v96_v18, 0.0 }
 0x171   :  { %98 = vadd.xlane.f32.xlu0 %v97_v19 }
 0x1fe   :  { %v99_v28 = vpop.xlane.xlu0 %98 }
 0x1ff   :  { %v100_v29 = vmul.f32 0.025, %v99_v28 }
 0x201   :  { %v101_v30 = vadd.f32 1e-05, %v100_v29 }
 0x203   :  { %428 = vrsqrt.f32 %v101_v30 }
 0x20d   :  { %v429_v34 = vpop.eup %428 }
 0x20e   :  { %v103_v36 = vmul.f32 %v429_v34, %v95_v17 }
 0x210   :  { %v108_v37 = vmul.f32 %v107_v33, %v103_v36 }
 0x212   :  { %v113_v38 = vadd.f32 %v112_v35, %v108_v37 }
 0x214   :  { %v114_v39 = vmax.f32 %v113_v38, 0.0 }
 0x216   :  { %403 = vmatmul.mubr.msk.f32.vlgmr.msra.gmra.mrb[0].mxu1 %vm89_vm2, %v114_v39 }
 0x217   :  { %413 = vmatprep.mubr.msk.f32.mxu1 %vm433_vm0, %v432_v0  ;;  %v215_v0 = vrot.slane %v28_v44, %v106_v31 }
 0x2e9   :  { %v193_v46 = vpop.f32.mrb[0].mxu1 }
 0x2ea   :  { %v194_v47 = vadd.f32 %v193_v46, %v123_v45  ;;  %v404_v48 = vpop.f32.mrb[1].mxu1 }
 0x2ec   :  { %v198_v49 = vsel %vm197_vm5, %v194_v47, 0.0 }
 0x2ed   :  { %199 = vadd.xlane.f32.xlu1 %v198_v49 }
 0x37a   :  { %v200_v50 = vpop.xlane.xlu1 %199 }
 0x37b   :  { %v202_v51 = vmul.f32 0.033333335, %v200_v50 }
 0x37d   :  { %v203_v52 = vsub.f32 %v194_v47, %v202_v51 }
 0x37f   :  { %v204_v53 = vmul.f32 %v203_v52, %v203_v52 }
 0x381   :  { %v205_v54 = vsel %vm197_vm5, %v204_v53, 0.0 }
 0x382   :  { %206 = vadd.xlane.f32.xlu1 %v205_v54 }
 0x40f   :  { %v207_v60 = vpop.xlane.xlu1 %206 }
 0x410   :  { %v208_v61 = vmul.f32 0.033333335, %v207_v60 }
 0x412   :  { %v209_v62 = vadd.f32 1e-05, %v208_v61 }
 0x414   :  { %430 = vrsqrt.f32 %v209_v62 }
 0x41e   :  { %v431_v2 = vpop.eup %430 }
 0x41f   :  { %v211_v3 = vmul.f32 %v431_v2, %v203_v52 }
 0x421   :  { %v216_v6 = vmul.f32 %v215_v0, %v211_v3 }
 0x423   :  { %v221_v8 = vadd.f32 %v220_v4, %v216_v6 }
 0x425   :  { %v275_v10 = vadd.f32 %v270_v7, %v221_v8 }
 0x427   :  { %v276_v11 = vmax.f32 %v275_v10, 0.0 }
 0x429   :  { %412 = vmatpush3.xpose.msk.msra.mxu1 %vm197_vm5, %v276_v11 }
 0x42c   :  { %414 = vmatmul.mubr.msk.f32.vlgmr.msra.gmra.mrb[2].mxu1 %vm197_vm5, %v280_v12 }
 0x4ff   :  { %v358_v14 = vpop.f32.mrb[2].mxu1 }
 0x500   :  { %v359_v15 = vadd.f32 %v358_v14, %v284_v13  ;;  %v415_v16 = vpop.f32.mrb[3].mxu1 }
 0x502   :  { %363 = vst.msk [vmem:[%s544_s7] sm:$0xff] %vm362_vm6, %v359_v15 }

</bundles_post_ra>
